<compile_context>
chip_gen: v7x
topology: tpu7x:2x2x1
jax: 0.10.0
libtpu: 0.0.40
codegen_flags: <defaults>
</compile_context>

<pallas_src>
import functools

import jax
import jax.numpy as jnp
from jax.experimental import pallas as pl
from jax.experimental.pallas import tpu as pltpu

Z_PRESENT_EPS = 1e-3   # module's self._z_present_eps
NOISE_EPS = 0.1        # deterministic "sample = loc + eps * scale" for what_fn / depth_fn


# --------------------------------------------------------------------------- #
# Pallas kernel: fused reset_non_present + present/what/depth sampling on
# flattened (M, d) row tiles.
# --------------------------------------------------------------------------- #
def _latent_kernel(zp_ref, wl_ref, ws_ref, dl_ref, ds_ref,
                   sp_ref, sw_ref, sd_ref, *, reset_non_present):
    f32 = jnp.float32
    zp = zp_ref[...].astype(f32)      # (TM, 1)
    wl = wl_ref[...].astype(f32)      # (TM, d_what)
    ws = ws_ref[...].astype(f32)      # (TM, d_what)
    dl = dl_ref[...].astype(f32)      # (TM, 1)
    ds = ds_ref[...].astype(f32)      # (TM, 1)

    if reset_non_present:             # static Python flag
        keep = zp > Z_PRESENT_EPS     # (TM, 1), broadcasts over lanes
        wl = jnp.where(keep, wl, 0.0)
        ws = jnp.where(keep, ws, 1.0)
        dl = jnp.where(keep, dl, 0.0)
        ds = jnp.where(keep, ds, 1.0)

    # present_fn: deterministic Bernoulli "mode" (0/1)
    sp_ref[...] = (zp > 0.5).astype(sp_ref.dtype)
    # what_fn / depth_fn: deterministic "loc + eps * scale"
    sw_ref[...] = (wl + NOISE_EPS * ws).astype(sw_ref.dtype)
    sd_ref[...] = (dl + NOISE_EPS * ds).astype(sd_ref.dtype)


def sample_latents_pallas(z_present, what_loc, what_scale,
                          depth_loc, depth_scale, *, reset_non_present):
    B, N, _ = z_present.shape
    d_what = what_loc.shape[-1]
    M = B * N

    # reshape = pure relabeling of leading dims (no data movement)
    zp = z_present.reshape(M, 1)
    wl = what_loc.reshape(M, d_what)
    ws = what_scale.reshape(M, d_what)
    dl = depth_loc.reshape(M, 1)
    ds = depth_scale.reshape(M, 1)

    # Large row tiles: either the whole array (legal full-extent block) or a
    # multiple-of-8 tile; well within the 16 MiB v5e default scoped VMEM even
    # with double buffering for typical d_what.
    TM = M if M <= 1024 else 1024
    grid = (pl.cdiv(M, TM),)

    def row_spec(d):
        return pl.BlockSpec((TM, d), lambda i: (i, 0))

    s_present, s_what, s_depth = pl.pallas_call(
        functools.partial(_latent_kernel, reset_non_present=reset_non_present),
        out_shape=(
            jax.ShapeDtypeStruct((M, 1), z_present.dtype),
            jax.ShapeDtypeStruct((M, d_what), what_loc.dtype),
            jax.ShapeDtypeStruct((M, 1), depth_loc.dtype),
        ),
        grid=grid,
        in_specs=[row_spec(1), row_spec(d_what), row_spec(d_what),
                  row_spec(1), row_spec(1)],
        out_specs=(row_spec(1), row_spec(d_what), row_spec(1)),
        compiler_params=pltpu.CompilerParams(dimension_semantics=("parallel",)),
    )(zp, wl, ws, dl, ds)

    return (s_present.reshape(B, N, 1),
            s_what.reshape(B, N, d_what),
            s_depth.reshape(B, N, 1))


# --------------------------------------------------------------------------- #
# LatentHandler wrapper (mirrors the PyTorch module's forward)
# --------------------------------------------------------------------------- #
class LatentHandler:
    def __init__(self, reset_non_present=False, negative_percentage=0.1,
                 max_objects=10, rng_key=None):
        self._reset_non_present = reset_non_present
        self._negative_percentage = negative_percentage
        self._max_objects = max_objects
        self._z_present_eps = Z_PRESENT_EPS
        # deterministic replacement for torch.randperm in negative_indices
        self._key = jax.random.PRNGKey(0) if rng_key is None else rng_key

    # ---- limit_positive: drop the lowest-z_present positives beyond max_objects ----
    def _limit_positive(self, sampled_present, z_present):
        sp = sampled_present[..., 0]                   # (B, N)
        zp = z_present[..., 0]                         # (B, N)
        pos = sp > 0
        n = jnp.sum(pos.astype(jnp.int32), axis=1)     # (B,)
        n_drop = jnp.maximum(n - self._max_objects, 0)
        # ascending rank by z_present among positives (non-positives pushed last)
        key = jnp.where(pos, zp, jnp.inf)
        asc = jnp.argsort(key, axis=1)
        rank = jnp.argsort(asc, axis=1)
        drop = pos & (rank < n_drop[:, None])
        return jnp.where(drop, 0.0, sp)[..., None]

    # ---- add_negative: mark a random subset of absent slots as -1 ----
    def _add_negative(self, sampled_present, key):
        sp2d = sampled_present[..., 0]                 # (B, N), entries 0/1
        B, N = sp2d.shape
        present = sp2d > 0
        n_present = jnp.sum(present.astype(jnp.int32), axis=1)     # (B,)
        negative_added = int(self._negative_percentage * N)
        # TODO(synk): the reference output width n_objects is data-dependent
        # (max over batch of n_present); a single scalar device->host read is
        # unavoidable to materialize that width.
        max_present = int(jax.device_get(jnp.max(n_present)))
        n_objects = max_present + negative_added

        # device-side replacement for torch.nonzero + randperm: random ranks
        # among the absent (zero) slots of each row.
        scores = jax.random.uniform(key, (B, N))
        scores = jnp.where(present, jnp.inf, scores)   # present slots ranked last
        order = jnp.argsort(scores, axis=1)
        rank = jnp.argsort(order, axis=1)              # random rank among zeros
        n_neg = n_objects - n_present                  # (B,) negatives per row
        neg = jnp.logical_not(present) & (rank < n_neg[:, None])
        modified = jnp.where(neg, -1.0, sp2d)[..., None]
        return modified, n_objects

    # ---- filter: each row has exactly n_objects nonzero entries after add_negative ----
    @staticmethod
    def _filter(tensor, present_mask2d, n_objects):
        # stable argsort puts the "present/negative" indices first, in original order
        order = jnp.argsort(jnp.logical_not(present_mask2d).astype(jnp.int32), axis=1)
        idx = order[:, :n_objects]                     # (B, n_objects)
        return jnp.take_along_axis(tensor, idx[..., None], axis=1)

    def __call__(self, latents):
        z_where, z_present, (what_loc, what_scale), (depth_loc, depth_scale) = latents

        # --- hot path: single fused Pallas kernel (reset + sampling fns) ---
        s_present, s_what, s_depth = sample_latents_pallas(
            z_present, what_loc, what_scale, depth_loc, depth_scale,
            reset_non_present=self._reset_non_present)
        s_where = z_where                              # where_fn: identity pass-through

        if self._max_objects is not None:
            s_present = self._limit_positive(s_present, z_present)

        # --- filter_representation (all static-shape, on device) ---
        self._key, sub = jax.random.split(self._key)
        modified_present, n_objects = self._add_negative(s_present, sub)
        present_mask2d = modified_present[..., 0] != 0          # (B, N)

        f_where = self._filter(s_where, present_mask2d, n_objects)
        f_present = self._filter(modified_present, present_mask2d, n_objects)
        f_what = self._filter(s_what, present_mask2d, n_objects)
        f_depth = self._filter(s_depth, present_mask2d, n_objects)
        return f_where, f_present, f_what, f_depth


# --------------------------------------------------------------------------- #
if __name__ == "__main__":
    key = jax.random.PRNGKey(0)
    B, N, D_WHERE, D_WHAT = 2, 16, 4, 32
    k = jax.random.split(key, 6)

    z_where = jax.random.normal(k[0], (B, N, D_WHERE), dtype=jnp.float32)
    z_present = jax.random.uniform(k[1], (B, N, 1), dtype=jnp.float32)
    z_what_loc = jax.random.normal(k[2], (B, N, D_WHAT), dtype=jnp.float32)
    z_what_scale = jax.random.uniform(k[3], (B, N, D_WHAT), dtype=jnp.float32) + 0.5
    z_depth_loc = jax.random.normal(k[4], (B, N, 1), dtype=jnp.float32)
    z_depth_scale = jax.random.uniform(k[5], (B, N, 1), dtype=jnp.float32) + 0.5

    latents = (z_where, z_present, (z_what_loc, z_what_scale),
               (z_depth_loc, z_depth_scale))

    handler = LatentHandler(reset_non_present=True, negative_percentage=0.1,
                            max_objects=3)
    f_where, f_present, f_what, f_depth = handler(latents)

    jax.block_until_ready((f_where, f_present, f_what, f_depth))
    assert f_where.shape[0] == B and f_where.shape[-1] == D_WHERE
    assert f_what.shape[-1] == D_WHAT and f_present.shape == f_depth.shape
    assert f_where.shape[1] == f_present.shape[1] == f_what.shape[1] == f_depth.shape[1]
    print("KERNEL_OK")
</pallas_src>

<mosaic_0001>
module attributes {stable_mosaic.version = 11 : i64} {
  func.func @_latent_kernel(%arg0: i32, %arg1: memref<32x1xf32, #tpu.memory_space<vmem>>, %arg2: memref<32x32xf32, #tpu.memory_space<vmem>>, %arg3: memref<32x32xf32, #tpu.memory_space<vmem>>, %arg4: memref<32x1xf32, #tpu.memory_space<vmem>>, %arg5: memref<32x1xf32, #tpu.memory_space<vmem>>, %arg6: memref<32x1xf32, #tpu.memory_space<vmem>>, %arg7: memref<32x32xf32, #tpu.memory_space<vmem>>, %arg8: memref<32x1xf32, #tpu.memory_space<vmem>>) attributes {dimension_semantics = [#tpu.dimension_semantics<parallel>], iteration_bounds = array<i64: 1>, scalar_prefetch = 0 : i64, scratch_operands = 0 : i64, tpu.core_type = #tpu.core_type<tc>, window_params = [{transform_indices = @transform_0, window_bounds = array<i64: 32, 1>}, {transform_indices = @transform_1, window_bounds = array<i64: 32, 32>}, {transform_indices = @transform_2, window_bounds = array<i64: 32, 32>}, {transform_indices = @transform_3, window_bounds = array<i64: 32, 1>}, {transform_indices = @transform_4, window_bounds = array<i64: 32, 1>}, {transform_indices = @transform_5, window_bounds = array<i64: 32, 1>}, {transform_indices = @transform_6, window_bounds = array<i64: 32, 32>}, {transform_indices = @transform_7, window_bounds = array<i64: 32, 1>}]} {
    %c0 = arith.constant 0 : index
    %c0_0 = arith.constant 0 : index
    %0 = vector.load %arg1[%c0, %c0_0] : memref<32x1xf32, #tpu.memory_space<vmem>>, vector<32x1xf32>
    %c0_1 = arith.constant 0 : index
    %c0_2 = arith.constant 0 : index
    %1 = vector.load %arg2[%c0_1, %c0_2] : memref<32x32xf32, #tpu.memory_space<vmem>>, vector<32x32xf32>
    %c0_3 = arith.constant 0 : index
    %c0_4 = arith.constant 0 : index
    %2 = vector.load %arg3[%c0_3, %c0_4] : memref<32x32xf32, #tpu.memory_space<vmem>>, vector<32x32xf32>
    %c0_5 = arith.constant 0 : index
    %c0_6 = arith.constant 0 : index
    %3 = vector.load %arg4[%c0_5, %c0_6] : memref<32x1xf32, #tpu.memory_space<vmem>>, vector<32x1xf32>
    %c0_7 = arith.constant 0 : index
    %c0_8 = arith.constant 0 : index
    %4 = vector.load %arg5[%c0_7, %c0_8] : memref<32x1xf32, #tpu.memory_space<vmem>>, vector<32x1xf32>
    %cst = arith.constant 1.000000e-03 : f32
    %5 = vector.broadcast %cst : f32 to vector<32x1xf32>
    %6 = arith.cmpf ogt, %0, %5 : vector<32x1xf32>
    %cst_9 = arith.constant 0.000000e+00 : f32
    %7 = vector.shape_cast %6 : vector<32x1xi1> to vector<32x1xi1>
    %8 = vector.broadcast %7 : vector<32x1xi1> to vector<32x32xi1>
    %9 = vector.broadcast %cst_9 : f32 to vector<32x32xf32>
    %10 = arith.select %8, %1, %9 : vector<32x32xi1>, vector<32x32xf32>
    %cst_10 = arith.constant 1.000000e+00 : f32
    %11 = vector.shape_cast %6 : vector<32x1xi1> to vector<32x1xi1>
    %12 = vector.broadcast %11 : vector<32x1xi1> to vector<32x32xi1>
    %13 = vector.broadcast %cst_10 : f32 to vector<32x32xf32>
    %14 = arith.select %12, %2, %13 : vector<32x32xi1>, vector<32x32xf32>
    %cst_11 = arith.constant 0.000000e+00 : f32
    %15 = vector.broadcast %cst_11 : f32 to vector<32x1xf32>
    %16 = arith.select %6, %3, %15 : vector<32x1xi1>, vector<32x1xf32>
    %cst_12 = arith.constant 1.000000e+00 : f32
    %17 = vector.broadcast %cst_12 : f32 to vector<32x1xf32>
    %18 = arith.select %6, %4, %17 : vector<32x1xi1>, vector<32x1xf32>
    %cst_13 = arith.constant 5.000000e-01 : f32
    %19 = vector.broadcast %cst_13 : f32 to vector<32x1xf32>
    %20 = arith.cmpf ogt, %0, %19 : vector<32x1xf32>
    %21 = arith.extui %20 : vector<32x1xi1> to vector<32x1xi32>
    %22 = arith.sitofp %21 : vector<32x1xi32> to vector<32x1xf32>
    %c0_14 = arith.constant 0 : index
    %c0_15 = arith.constant 0 : index
    %23 = vector.load %arg6[%c0_14, %c0_15] : memref<32x1xf32, #tpu.memory_space<vmem>>, vector<32x1xf32>
    tpu.vector_store %arg6[%c0_14, %c0_15], %22 {strides = array<i32>} : memref<32x1xf32, #tpu.memory_space<vmem>>, vector<32x1xf32>,
    %cst_16 = arith.constant 1.000000e-01 : f32
    %24 = vector.broadcast %cst_16 : f32 to vector<32x32xf32>
    %25 = arith.mulf %24, %14 : vector<32x32xf32>
    %26 = arith.addf %10, %25 : vector<32x32xf32>
    %c0_17 = arith.constant 0 : index
    %c0_18 = arith.constant 0 : index
    %27 = vector.load %arg7[%c0_17, %c0_18] : memref<32x32xf32, #tpu.memory_space<vmem>>, vector<32x32xf32>
    tpu.vector_store %arg7[%c0_17, %c0_18], %26 {strides = array<i32>} : memref<32x32xf32, #tpu.memory_space<vmem>>, vector<32x32xf32>,
    %cst_19 = arith.constant 1.000000e-01 : f32
    %28 = vector.broadcast %cst_19 : f32 to vector<32x1xf32>
    %29 = arith.mulf %28, %18 : vector<32x1xf32>
    %30 = arith.addf %16, %29 : vector<32x1xf32>
    %c0_20 = arith.constant 0 : index
    %c0_21 = arith.constant 0 : index
    %31 = vector.load %arg8[%c0_20, %c0_21] : memref<32x1xf32, #tpu.memory_space<vmem>>, vector<32x1xf32>
    tpu.vector_store %arg8[%c0_20, %c0_21], %30 {strides = array<i32>} : memref<32x1xf32, #tpu.memory_space<vmem>>, vector<32x1xf32>,
    return
  }
  func.func @transform_0(%arg0: i32) -> (i32, i32) {
    %c0_i32 = arith.constant 0 : i32
    %c0_i32_0 = arith.constant 0 : i32
    return %arg0, %c0_i32 : i32, i32
  }
  func.func @transform_1(%arg0: i32) -> (i32, i32) {
    %c0_i32 = arith.constant 0 : i32
    %c0_i32_0 = arith.constant 0 : i32
    return %arg0, %c0_i32 : i32, i32
  }
  func.func @transform_2(%arg0: i32) -> (i32, i32) {
    %c0_i32 = arith.constant 0 : i32
    %c0_i32_0 = arith.constant 0 : i32
    return %arg0, %c0_i32 : i32, i32
  }
  func.func @transform_3(%arg0: i32) -> (i32, i32) {
    %c0_i32 = arith.constant 0 : i32
    %c0_i32_0 = arith.constant 0 : i32
    return %arg0, %c0_i32 : i32, i32
  }
  func.func @transform_4(%arg0: i32) -> (i32, i32) {
    %c0_i32 = arith.constant 0 : i32
    %c0_i32_0 = arith.constant 0 : i32
    return %arg0, %c0_i32 : i32, i32
  }
  func.func @transform_5(%arg0: i32) -> (i32, i32) {
    %c0_i32 = arith.constant 0 : i32
    %c0_i32_0 = arith.constant 0 : i32
    return %arg0, %c0_i32 : i32, i32
  }
  func.func @transform_6(%arg0: i32) -> (i32, i32) {
    %c0_i32 = arith.constant 0 : i32
    %c0_i32_0 = arith.constant 0 : i32
    return %arg0, %c0_i32 : i32, i32
  }
  func.func @transform_7(%arg0: i32) -> (i32, i32) {
    %c0_i32 = arith.constant 0 : i32
    %c0_i32_0 = arith.constant 0 : i32
    return %arg0, %c0_i32 : i32, i32
  }
}

</mosaic_0001>

<bundles_post_ra>
// kernel: tpu_custom_call.1
= control target key start
LH: loop header
LB: loop body
LE: loop exit
PB: predicated region body
PF: predicated region fallthrough
CT: control target
= control target key end

     0   :  { %vm96_vm0 = vcmask 7168   ;;  %v185_v3 = vmov 0   ;;  %v186_v10 = vmov 0.0   ;;  %s338_s0 = inlined_call_operand.vmem [shape: f32[32,1], index: 0, kind: input, shape index: {}]   ;;  %s339_s1 = inlined_call_operand.vmem [shape: f32[32,32], index: 1, kind: input, shape index: {}]   ;;  %s340_s2 = inlined_call_operand.vmem [shape: f32[32,32], index: 2, kind: input, shape index: {}]   ;;  %s341_s3 = inlined_call_operand.vmem [shape: f32[32,1], index: 3, kind: input, shape index: {}]   ;;  %s342_s4 = inlined_call_operand.vmem [shape: f32[32,1], index: 4, kind: input, shape index: {}]   ;;  %s343_s5 = inlined_call_operand.vmem [shape: f32[32,1], index: 5, kind: output, shape index: {0}]   ;;  %s344_s6 = inlined_call_operand.hbm [shape: f32[32,32], index: 6, kind: output, shape index: {1}]   ;;  %s345_s7 = inlined_call_operand.vmem [shape: f32[32,1], index: 7, kind: output, shape index: {2}]  }
   0x1   :  { %v26_v0 = vld [vmem:[%s338_s0 + $0x10] sm:$0xff]  ;;  %160 = vset.pattern.permute.xlu1 %v185_v3  ;;  %159 = vset.pattern.permute.xlu0 %v185_v3  ;;  %v24_v4 = vld [vmem:[%s338_s0] sm:$0xff]  ;;  %v27_v12 = vld [vmem:[%s338_s0 + $0x18] sm:$0xff] }
   0x2   :  { %v38_v1 = vld [vmem:[%s341_s3 + $0x10] sm:$0xff]  ;;  %vm46_vm1 = vcmp.gt.f32.partialorder %v26_v0, 0.001  ;;  %vm86_vm2 = vcmp.gt.f32.partialorder %v26_v0, 0.5  ;;  %v36_v5 = vld [vmem:[%s341_s3] sm:$0xff]  ;;  %v39_v13 = vld [vmem:[%s341_s3 + $0x18] sm:$0xff] }
   0x3   :  { %v42_v2 = vld [vmem:[%s342_s4 + $0x10] sm:$0xff]  ;;  %v40_v6 = vld [vmem:[%s342_s4] sm:$0xff]  ;;  %v50_v7 = vsel %vm46_vm1, 1, %v185_v3  ;;  %v78_v8 = vsel %vm46_vm1, %v38_v1, 0.0  ;;  %v152_v11 = vsel %vm86_vm2, 1.0, %v186_v10  ;;  %vm84_vm4 = vcmp.gt.f32.partialorder %v24_v4, 0.5 }
   0x4   :  { %v82_v9 = vsel %vm46_vm1, %v42_v2, 1.0  ;;  %99 = vst.msk [vmem:[%s343_s5 + $0x10] sm:$0xff] %vm96_vm0, %v152_v11  ;;  %59 = vperm.xlu1 %160, %v50_v7   ;;  %vm44_vm3 = vcmp.gt.f32.partialorder %v24_v4, 0.001  ;;  %v43_v15 = vld [vmem:[%s342_s4 + $0x18] sm:$0xff]  ;;  %v150_v19 = vsel %vm84_vm4, 1.0, %v186_v10 }
   0x5   :  { %v116_v14 = vmul.f32 0.1, %v82_v9  ;;  %v48_v16 = vsel %vm44_vm3, 1, %v185_v3  ;;  %v76_v17 = vsel %vm44_vm3, %v36_v5, 0.0  ;;  %v80_v18 = vsel %vm44_vm3, %v40_v6, 1.0  ;;  %v25_v20 = vld [vmem:[%s338_s0 + $0x8] sm:$0xff] }
   0x6   :  { %v37_v21 = vld [vmem:[%s341_s3 + $0x8] sm:$0xff]  ;;  %97 = vst.msk [vmem:[%s343_s5] sm:$0xff] %vm96_vm0, %v150_v19  ;;  %v114_v23 = vmul.f32 0.1, %v80_v18  ;;  %53 = vperm.xlu0 %159, %v48_v16   ;;  %vm47_vm5 = vcmp.gt.f32.partialorder %v27_v12, 0.001 }
   0x7   :  { %v120_v22 = vadd.f32 %v116_v14, %v78_v8  ;;  %vm87_vm6 = vcmp.gt.f32.partialorder %v27_v12, 0.5  ;;  %v41_v24 = vld [vmem:[%s342_s4 + $0x8] sm:$0xff]  ;;  %v51_v25 = vsel %vm47_vm5, 1, %v185_v3  ;;  %v79_v26 = vsel %vm47_vm5, %v39_v13, 0.0 }
   0x8   :  { %v83_v27 = vsel %vm47_vm5, %v43_v15, 1.0  ;;  %v153_v28 = vsel %vm87_vm6, 1.0, %v186_v10  ;;  %v118_v29 = vadd.f32 %v114_v23, %v76_v17  ;;  %62 = vperm.xlu1 %160, %v51_v25   ;;  %vm45_vm7 = vcmp.gt.f32.partialorder %v25_v20, 0.001 }
   0x9   :  { %124 = vst.msk [vmem:[%s345_s7 + $0x10] sm:$0xff] %vm96_vm0, %v120_v22  ;;  %100 = vst.msk [vmem:[%s343_s5 + $0x18] sm:$0xff] %vm96_vm0, %v153_v28  ;;  %v117_v30 = vmul.f32 0.1, %v83_v27  ;;  %vm85_vm8 = vcmp.gt.f32.partialorder %v25_v20, 0.5  ;;  %v49_v31 = vsel %vm45_vm7, 1, %v185_v3 }
   0xa   :  { %v77_v32 = vsel %vm45_vm7, %v37_v21, 0.0  ;;  %v81_v33 = vsel %vm45_vm7, %v41_v24, 1.0  ;;  %v151_v34 = vsel %vm85_vm8, 1.0, %v186_v10  ;;  %122 = vst.msk [vmem:[%s345_s7] sm:$0xff] %vm96_vm0, %v118_v29  ;;  %56 = vperm.xlu0 %159, %v49_v31  }
   0xb   :  { %v121_v35 = vadd.f32 %v117_v30, %v79_v26  ;;  %98 = vst.msk [vmem:[%s343_s5 + $0x8] sm:$0xff] %vm96_vm0, %v151_v34  ;;  %v115_v36 = vmul.f32 0.1, %v81_v33 }
   0xc   :  { %13 = vsyncpa [#allocation3], 0  ;;  %v34_v38 = vld [vmem:[%s340_s2 + $0x10] sm:$0xff]  ;;  %v32_v41 = vld [vmem:[%s340_s2] sm:$0xff]  ;;  %vm109_vm11 = vcmask 261120   ;;  %s187_s0 = smov [#allocation2]  }
   0xd   :  { %125 = vst.msk [vmem:[%s345_s7 + $0x18] sm:$0xff] %vm96_vm0, %v121_v35  ;;  %v119_v37 = vadd.f32 %v115_v36, %v77_v32  ;;  %v30_v40 = vld [vmem:[%s339_s1 + $0x10] sm:$0xff]  ;;  %v28_v45 = vld [vmem:[%s339_s1] sm:$0xff]  ;;  %v35_v46 = vld [vmem:[%s340_s2 + $0x18] sm:$0xff]  ;;  %s133_s3 = sshll.u32 %s187_s0, 4  ;;  %s134_s3 = int_to_ptr.vmem [resolvable:$true] %s133_s3 }
   0xe   :  { %v31_v52 = vld [vmem:[%s339_s1 + $0x18] sm:$0xff]  ;;  %v33_v53 = vld [vmem:[%s340_s2 + $0x8] sm:$0xff]  ;;  %s161_s2 = scalar_lea.vmem %s134_s3, 512  ;;  %p166_p1 = scmp.lt.s32.totalorder %s134_s3, %s134_s3 }
   0xf   :  { %123 = vst.msk [vmem:[%s345_s7 + $0x8] sm:$0xff] %vm96_vm0, %v119_v37  ;;  %v29_v59 = vld [vmem:[%s339_s1 + $0x8] sm:$0xff]  ;;  %p162_p0 = scmp.ne.s32.totalorder %s134_s3, %s161_s2  ;;  %p167_p2 = scmp.lt.s32.totalorder %s161_s2, %s161_s2 }
  0x11   :  { %p168_p3 = por %p167_p2, %p166_p1 }
  0x13   :  { %p169_p4 = pnand %p168_p3, %p162_p0 }
  0x83   :  { %v60_v39 = vpop.permute.xlu1 %59 }
  0x84   :  { %vm66_vm9 = vcmp.eq.s32.totalorder %v60_v39, 1 }
  0x85   :  { %v74_v42 = vsel %vm66_vm9, %v34_v38, 1.0  ;;  %v54_v43 = vpop.permute.xlu0 %53  ;;  %v70_v47 = vsel %vm66_vm9, %v30_v40, 0.0 }
  0x86   :  { %v103_v44 = vmul.f32 0.1, %v74_v42  ;;  %vm64_vm10 = vcmp.eq.s32.totalorder %v54_v43, 1 }
  0x87   :  { %v72_v48 = vsel %vm64_vm10, %v32_v41, 1.0  ;;  %v63_v49 = vpop.permute.xlu1 %62  ;;  %v68_v54 = vsel %vm64_vm10, %v28_v45, 0.0 }
  0x88   :  { %v107_v50 = vadd.f32 %v103_v44, %v70_v47  ;;  %v101_v51 = vmul.f32 0.1, %v72_v48  ;;  %vm67_vm12 = vcmp.eq.s32.totalorder %v63_v49, 1 }
  0x89   :  { %v75_v55 = vsel %vm67_vm12, %v35_v46, 1.0  ;;  %v57_v56 = vpop.permute.xlu0 %56  ;;  %v71_v60 = vsel %vm67_vm12, %v31_v52, 0.0 }
  0x8a   :  { %112 = vst.msk [vmem:[#allocation2 + $0x10] sm:$0xff] %vm109_vm11, %v107_v50  ;;  %v105_v57 = vadd.f32 %v101_v51, %v68_v54  ;;  %v104_v58 = vmul.f32 0.1, %v75_v55  ;;  %vm65_vm13 = vcmp.eq.s32.totalorder %v57_v56, 1 }
  0x8b   :  { %v73_v61 = vsel %vm65_vm13, %v33_v53, 1.0  ;;  %v69_v0 = vsel %vm65_vm13, %v29_v59, 0.0 }
  0x8c   :  { %110 = vst.msk [vmem:[#allocation2] sm:$0xff] %vm109_vm11, %v105_v57  ;;  %v108_v62 = vadd.f32 %v104_v58, %v71_v60  ;;  %v102_v63 = vmul.f32 0.1, %v73_v61 }
  0x8e   :  { %113 = vst.msk [vmem:[#allocation2 + $0x18] sm:$0xff] %vm109_vm11, %v108_v62  ;;  %v106_v1 = vadd.f32 %v102_v63, %v69_v0 }
  0x90   :  { %111 = vst.msk [vmem:[#allocation2 + $0x8] sm:$0xff] %vm109_vm11, %v106_v1 }
  0x91   :  { %172 = shalt.err (!%p169_p4)
}
  0x92   :  { %s173_s30 = scalar_lea.hbm %s344_s6, 512 }
  0x93   :  { %p174_p5 = scmp.ne.s32.totalorder %s344_s6, %s173_s30  ;;  %p177_p6 = scmp.lt.u32.totalorder %s173_s30, %s344_s6 }
  0x95   :  { %p179_p7 = pnand %p177_p6, %p174_p5 }
  0x97   :  { %182 = shalt.err (!%p179_p7)
}
  0x98   :  { %s188_s11 = smov 128   ;;  %s189_s12 = smov 8  }
  0x99   :  { %139 = dma.vmem_to_hbm [thread:$0]  %s134_s3, 512, %s344_s6, [#allocation3], %s188_s11, %s188_s11, %s189_s12  }
  0x9a   :  { %183 = dma.done.wait [#allocation3], 512  }
  0x9b   :  { %184 = vsyncadd [#allocation3], 4294966784 }
  0x9c   :  { %149 = vsyncpa [#allocation3], 1 }

</bundles_post_ra>
